<compile_context>
chip_gen: v7x
topology: tpu7x:2x2x1
jax: 0.10.0
libtpu: 0.0.40
codegen_flags: <defaults>
</compile_context>

<pallas_src>
import functools

import jax
import jax.numpy as jnp
from jax.experimental import pallas as pl
from jax.experimental.pallas import tpu as pltpu


# ---------------------------------------------------------------------------
# Kernel: per-tile partial sums (no shared accumulator, fully parallel axis)
# ---------------------------------------------------------------------------
def _fused_ce_partials_kernel(pre_r_ref, lab_r_ref,
                              pre_t_ref, lab_t_ref,
                              pre_p_ref, lab_p_ref,
                              out_r_ref, out_t_ref, out_p_ref,
                              *, n_total, batch_tile, ragged):
    """Each grid step writes sum over its batch tile of (label*pre), folded to
    an (8, c) slab per loss, into its own output block."""
    t = pl.program_id(0)
    nfold = batch_tile // 8

    def fold(pre_ref, lab_ref, out_ref, mask):
        c = pre_ref.shape[1]
        prod = pre_ref[...].astype(jnp.float32) * lab_ref[...].astype(jnp.float32)
        if mask is not None:
            prod = jnp.where(mask, prod, 0.0)
        # Layout-preserving fold: last dim stays the lane dim -> pure VPU adds.
        out_ref[...] = prod.reshape(nfold, 8, c).sum(axis=0).reshape(1, 8, c)

    def do_all(mask):
        fold(pre_r_ref, lab_r_ref, out_r_ref, mask)
        fold(pre_t_ref, lab_t_ref, out_t_ref, mask)
        fold(pre_p_ref, lab_p_ref, out_p_ref, mask)

    if ragged:
        last = pl.num_programs(0) - 1

        @pl.when(t == last)
        def _masked_tail():
            rows = t * batch_tile + jax.lax.broadcasted_iota(
                jnp.int32, (batch_tile, 1), 0)
            do_all(rows < n_total)

        @pl.when(t != last)
        def _fast_path():
            do_all(None)
    else:
        do_all(None)


# ---------------------------------------------------------------------------
# Tile sizing (lane-padding aware)
# ---------------------------------------------------------------------------
def _round_up(x, m):
    return ((x + m - 1) // m) * m


def _sublane_align(dtype):
    bits = jnp.dtype(dtype).itemsize * 8
    return {32: 8, 16: 16, 8: 32}.get(bits, 8)


def _choose_batch_tile(n, class_dims, dtype_pairs,
                       vmem_budget_bytes=36 * 1024 * 1024, cap=4096):
    """Largest sublane-aligned batch tile whose double-buffered inputs plus the
    double-buffered (1, 8, c) f32 output blocks fit a ~36 MiB data budget
    (safe under the explicit 48 MiB scoped-VMEM limit on v5e/v6e/v7x).
    Class dims are rounded up to 128 lanes (true VMEM footprint)."""
    align = max(max(_sublane_align(p), _sublane_align(l)) for p, l in dtype_pairs)
    per_row = 0
    out_bytes = 0
    for c, (pdt, ldt) in zip(class_dims, dtype_pairs):
        c_pad = _round_up(c, 128)
        # pre + label, each double-buffered by the BlockSpec pipeline.
        per_row += 2 * (jnp.dtype(pdt).itemsize + jnp.dtype(ldt).itemsize) * c_pad
        # (1, 8, c) f32 output block, double-buffered.
        out_bytes += 2 * 8 * c_pad * 4
    budget = max(vmem_budget_bytes - out_bytes, per_row * align)
    tile = budget // max(per_row, 1)
    tile = min(tile, cap, _round_up(n, align))
    tile = max(align, (tile // align) * align)
    return int(tile)


# ---------------------------------------------------------------------------
# Wrapper: DiscreteSpherLoss(loss_type='CE').forward
# ---------------------------------------------------------------------------
def discrete_spher_loss(ori_pre_dict: dict, ori_label_dict: dict) -> dict:
    names = ("r_encode", "theta_encode", "phi_encode")
    pres = [ori_pre_dict[k] for k in names]
    labs = [ori_label_dict[k] for k in names]

    n = pres[0].shape[0]
    for p_, l_ in zip(pres, labs):
        assert p_.ndim == 2 and l_.shape == p_.shape and p_.shape[0] == n, (
            "expected matching 2-D (batch, bins) tensors with shared batch")

    class_dims = [p_.shape[1] for p_ in pres]
    dtype_pairs = [(p_.dtype, l_.dtype) for p_, l_ in zip(pres, labs)]

    batch_tile = _choose_batch_tile(n, class_dims, dtype_pairs)
    n_tiles = pl.cdiv(n, batch_tile)
    ragged = (n % batch_tile) != 0

    kernel = functools.partial(_fused_ce_partials_kernel,
                               n_total=n,
                               batch_tile=batch_tile,
                               ragged=ragged)

    in_specs, args = [], []
    out_specs, out_shapes = [], []
    for p_, l_ in zip(pres, labs):
        c = p_.shape[1]
        spec = pl.BlockSpec((batch_tile, c), lambda t: (t, 0))
        in_specs += [spec, spec]
        args += [p_, l_]
        out_specs.append(pl.BlockSpec((1, 8, c), lambda t: (t, 0, 0)))
        out_shapes.append(jax.ShapeDtypeStruct((n_tiles, 8, c), jnp.float32))

    # Advisory cost hint: pure HBM streaming, ~2 flops per element read.
    total_elems = sum(n * c for c in class_dims)
    bytes_in = sum(n * c * (jnp.dtype(pd).itemsize + jnp.dtype(ld).itemsize)
                   for c, (pd, ld) in zip(class_dims, dtype_pairs))
    bytes_out = sum(n_tiles * 8 * c * 4 for c in class_dims)
    cost = pl.CostEstimate(flops=2 * total_elems,
                           transcendentals=0,
                           bytes_accessed=bytes_in + bytes_out)

    outs = pl.pallas_call(
        kernel,
        out_shape=tuple(out_shapes),
        grid_spec=pltpu.PrefetchScalarGridSpec(
            num_scalar_prefetch=0,
            grid=(n_tiles,),
            in_specs=in_specs,
            out_specs=tuple(out_specs),
        ),
        compiler_params=pltpu.CompilerParams(
            # Per-tile independent partial sums -> tile axis is parallel
            # (shards across both TensorCores on v7x; no-op on v5e/v6e).
            dimension_semantics=("parallel",),
            # Above v5e's 16 MiB scoped default, below v7x's 64 MiB physical.
            vmem_limit_bytes=48 * 1024 * 1024,
        ),
        cost_estimate=cost,
    )(*args)

    # Tiny final reduce + (-1/N) scale in plain JAX.
    inv_n = jnp.float32(1.0 / n)
    out_r, out_t, out_p = outs
    return {
        "r_loss": -jnp.sum(out_r) * inv_n,
        "theta_loss": -jnp.sum(out_t) * inv_n,
        "phi_loss": -jnp.sum(out_p) * inv_n,
    }


# ---------------------------------------------------------------------------
# Test
# ---------------------------------------------------------------------------
def _reference_ce(pre, label):
    return -jnp.mean(jnp.sum(label.astype(jnp.float32) * pre.astype(jnp.float32),
                             axis=1))


if __name__ == "__main__":
    key = jax.random.PRNGKey(0)
    names = ("r_encode", "theta_encode", "phi_encode")
    loss_names = ("r_loss", "theta_loss", "phi_loss")
    class_dims = (128, 96, 64)  # different bin counts per spherical coordinate

    def build_inputs(n, k):
        keys = jax.random.split(k, 2 * len(names))
        pre_d, lab_d = {}, {}
        for i, (name, c) in enumerate(zip(names, class_dims)):
            # 'pre' plays the role of log-probabilities, 'label' a soft target.
            pre_d[name] = jax.nn.log_softmax(
                jax.random.normal(keys[2 * i], (n, c), jnp.float32), axis=-1)
            lab_d[name] = jax.nn.softmax(
                jax.random.normal(keys[2 * i + 1], (n, c), jnp.float32), axis=-1)
        return pre_d, lab_d

    # n=16: exact tiling; n=20: exercises the ragged / masked-last-tile path.
    for n in (16, 20):
        pre_d, lab_d = build_inputs(n, jax.random.fold_in(key, n))
        out = discrete_spher_loss(pre_d, lab_d)
        out = jax.tree_util.tree_map(jax.block_until_ready, out)
        for enc_name, loss_name in zip(names, loss_names):
            ref = _reference_ce(pre_d[enc_name], lab_d[enc_name])
            assert jnp.allclose(out[loss_name], ref, atol=1e-5, rtol=1e-5), (
                n, loss_name, out[loss_name], ref)

    print("KERNEL_OK")
</pallas_src>

<mosaic_0001>
module attributes {stable_mosaic.version = 11 : i64} {
  func.func @_fused_ce_partials_kernel(%arg0: i32, %arg1: memref<16x128xf32, #tpu.memory_space<vmem>>, %arg2: memref<16x128xf32, #tpu.memory_space<vmem>>, %arg3: memref<16x96xf32, #tpu.memory_space<vmem>>, %arg4: memref<16x96xf32, #tpu.memory_space<vmem>>, %arg5: memref<16x64xf32, #tpu.memory_space<vmem>>, %arg6: memref<16x64xf32, #tpu.memory_space<vmem>>, %arg7: memref<1x8x128xf32, #tpu.memory_space<vmem>>, %arg8: memref<1x8x96xf32, #tpu.memory_space<vmem>>, %arg9: memref<1x8x64xf32, #tpu.memory_space<vmem>>) attributes {dimension_semantics = [#tpu.dimension_semantics<parallel>], iteration_bounds = array<i64: 1>, scalar_prefetch = 0 : i64, scratch_operands = 0 : i64, tpu.core_type = #tpu.core_type<tc>, window_params = [{transform_indices = @transform_0, window_bounds = array<i64: 16, 128>}, {transform_indices = @transform_1, window_bounds = array<i64: 16, 128>}, {transform_indices = @transform_2, window_bounds = array<i64: 16, 96>}, {transform_indices = @transform_3, window_bounds = array<i64: 16, 96>}, {transform_indices = @transform_4, window_bounds = array<i64: 16, 64>}, {transform_indices = @transform_5, window_bounds = array<i64: 16, 64>}, {transform_indices = @transform_6, window_bounds = array<i64: 1, 8, 128>}, {transform_indices = @transform_7, window_bounds = array<i64: 1, 8, 96>}, {transform_indices = @transform_8, window_bounds = array<i64: 1, 8, 64>}]} {
    %c0 = arith.constant 0 : index
    %c0_0 = arith.constant 0 : index
    %0 = vector.load %arg1[%c0, %c0_0] : memref<16x128xf32, #tpu.memory_space<vmem>>, vector<16x128xf32>
    %c0_1 = arith.constant 0 : index
    %c0_2 = arith.constant 0 : index
    %1 = vector.load %arg2[%c0_1, %c0_2] : memref<16x128xf32, #tpu.memory_space<vmem>>, vector<16x128xf32>
    %2 = arith.mulf %0, %1 : vector<16x128xf32>
    %3 = vector.shape_cast %2 : vector<16x128xf32> to vector<2x8x128xf32>
    %cst = arith.constant dense<0.000000e+00> : vector<8x128xf32>
    %4 = vector.multi_reduction <add>, %3, %cst [0] : vector<2x8x128xf32> to vector<8x128xf32>
    %5 = vector.shape_cast %4 : vector<8x128xf32> to vector<1x8x128xf32>
    %c0_3 = arith.constant 0 : index
    %c0_4 = arith.constant 0 : index
    %c0_5 = arith.constant 0 : index
    %6 = vector.load %arg7[%c0_3, %c0_4, %c0_5] : memref<1x8x128xf32, #tpu.memory_space<vmem>>, vector<1x8x128xf32>
    tpu.vector_store %arg7[%c0_3, %c0_4, %c0_5], %5 {strides = array<i32>} : memref<1x8x128xf32, #tpu.memory_space<vmem>>, vector<1x8x128xf32>,
    %c0_6 = arith.constant 0 : index
    %c0_7 = arith.constant 0 : index
    %7 = vector.load %arg3[%c0_6, %c0_7] : memref<16x96xf32, #tpu.memory_space<vmem>>, vector<16x96xf32>
    %c0_8 = arith.constant 0 : index
    %c0_9 = arith.constant 0 : index
    %8 = vector.load %arg4[%c0_8, %c0_9] : memref<16x96xf32, #tpu.memory_space<vmem>>, vector<16x96xf32>
    %9 = arith.mulf %7, %8 : vector<16x96xf32>
    %10 = vector.shape_cast %9 : vector<16x96xf32> to vector<2x8x96xf32>
    %cst_10 = arith.constant dense<0.000000e+00> : vector<8x96xf32>
    %11 = vector.multi_reduction <add>, %10, %cst_10 [0] : vector<2x8x96xf32> to vector<8x96xf32>
    %12 = vector.shape_cast %11 : vector<8x96xf32> to vector<1x8x96xf32>
    %c0_11 = arith.constant 0 : index
    %c0_12 = arith.constant 0 : index
    %c0_13 = arith.constant 0 : index
    %13 = vector.load %arg8[%c0_11, %c0_12, %c0_13] : memref<1x8x96xf32, #tpu.memory_space<vmem>>, vector<1x8x96xf32>
    tpu.vector_store %arg8[%c0_11, %c0_12, %c0_13], %12 {strides = array<i32>} : memref<1x8x96xf32, #tpu.memory_space<vmem>>, vector<1x8x96xf32>,
    %c0_14 = arith.constant 0 : index
    %c0_15 = arith.constant 0 : index
    %14 = vector.load %arg5[%c0_14, %c0_15] : memref<16x64xf32, #tpu.memory_space<vmem>>, vector<16x64xf32>
    %c0_16 = arith.constant 0 : index
    %c0_17 = arith.constant 0 : index
    %15 = vector.load %arg6[%c0_16, %c0_17] : memref<16x64xf32, #tpu.memory_space<vmem>>, vector<16x64xf32>
    %16 = arith.mulf %14, %15 : vector<16x64xf32>
    %17 = vector.shape_cast %16 : vector<16x64xf32> to vector<2x8x64xf32>
    %cst_18 = arith.constant dense<0.000000e+00> : vector<8x64xf32>
    %18 = vector.multi_reduction <add>, %17, %cst_18 [0] : vector<2x8x64xf32> to vector<8x64xf32>
    %19 = vector.shape_cast %18 : vector<8x64xf32> to vector<1x8x64xf32>
    %c0_19 = arith.constant 0 : index
    %c0_20 = arith.constant 0 : index
    %c0_21 = arith.constant 0 : index
    %20 = vector.load %arg9[%c0_19, %c0_20, %c0_21] : memref<1x8x64xf32, #tpu.memory_space<vmem>>, vector<1x8x64xf32>
    tpu.vector_store %arg9[%c0_19, %c0_20, %c0_21], %19 {strides = array<i32>} : memref<1x8x64xf32, #tpu.memory_space<vmem>>, vector<1x8x64xf32>,
    return
  }
  func.func @transform_0(%arg0: i32) -> (i32, i32) {
    %c0_i32 = arith.constant 0 : i32
    %c0_i32_0 = arith.constant 0 : i32
    return %arg0, %c0_i32 : i32, i32
  }
  func.func @transform_1(%arg0: i32) -> (i32, i32) {
    %c0_i32 = arith.constant 0 : i32
    %c0_i32_0 = arith.constant 0 : i32
    return %arg0, %c0_i32 : i32, i32
  }
  func.func @transform_2(%arg0: i32) -> (i32, i32) {
    %c0_i32 = arith.constant 0 : i32
    %c0_i32_0 = arith.constant 0 : i32
    return %arg0, %c0_i32 : i32, i32
  }
  func.func @transform_3(%arg0: i32) -> (i32, i32) {
    %c0_i32 = arith.constant 0 : i32
    %c0_i32_0 = arith.constant 0 : i32
    return %arg0, %c0_i32 : i32, i32
  }
  func.func @transform_4(%arg0: i32) -> (i32, i32) {
    %c0_i32 = arith.constant 0 : i32
    %c0_i32_0 = arith.constant 0 : i32
    return %arg0, %c0_i32 : i32, i32
  }
  func.func @transform_5(%arg0: i32) -> (i32, i32) {
    %c0_i32 = arith.constant 0 : i32
    %c0_i32_0 = arith.constant 0 : i32
    return %arg0, %c0_i32 : i32, i32
  }
  func.func @transform_6(%arg0: i32) -> (i32, i32, i32) {
    %c0_i32 = arith.constant 0 : i32
    %c0_i32_0 = arith.constant 0 : i32
    %c0_i32_1 = arith.constant 0 : i32
    return %arg0, %c0_i32, %c0_i32_0 : i32, i32, i32
  }
  func.func @transform_7(%arg0: i32) -> (i32, i32, i32) {
    %c0_i32 = arith.constant 0 : i32
    %c0_i32_0 = arith.constant 0 : i32
    %c0_i32_1 = arith.constant 0 : i32
    return %arg0, %c0_i32, %c0_i32_0 : i32, i32, i32
  }
  func.func @transform_8(%arg0: i32) -> (i32, i32, i32) {
    %c0_i32 = arith.constant 0 : i32
    %c0_i32_0 = arith.constant 0 : i32
    %c0_i32_1 = arith.constant 0 : i32
    return %arg0, %c0_i32, %c0_i32_0 : i32, i32, i32
  }
}

</mosaic_0001>

<bundles_post_ra>
// kernel: tpu_custom_call.1
= control target key start
LH: loop header
LB: loop body
LE: loop exit
PB: predicated region body
PF: predicated region fallthrough
CT: control target
= control target key end

     0   :  { %14 = vsyncpa [#allocation3], 0  ;;  %s572_s0 = inlined_call_operand.hbm [shape: f32[16,128], index: 0, kind: input, shape index: {}]   ;;  %s573_s1 = inlined_call_operand.hbm [shape: f32[16,128], index: 1, kind: input, shape index: {}]   ;;  %s574_s2 = inlined_call_operand.hbm [shape: f32[16,96], index: 2, kind: input, shape index: {}]   ;;  %s575_s3 = inlined_call_operand.hbm [shape: f32[16,96], index: 3, kind: input, shape index: {}]   ;;  %s576_s4 = inlined_call_operand.hbm [shape: f32[16,64], index: 4, kind: input, shape index: {}]   ;;  %s577_s5 = inlined_call_operand.vmem [shape: f32[16,64], index: 5, kind: input, shape index: {}]   ;;  %s578_s6 = inlined_call_operand.hbm [shape: f32[1,8,128], index: 6, kind: output, shape index: {0}]   ;;  %s579_s7 = inlined_call_operand.hbm [shape: f32[1,8,96], index: 7, kind: output, shape index: {1}]   ;;  %s580_s8 = inlined_call_operand.hbm [shape: f32[1,8,64], index: 8, kind: output, shape index: {2}]  }
   0x1   :  { %15 = vsyncpa [#allocation6], 0 }
   0x2   :  { %16 = vsyncpa [#allocation9], 0 }
   0x3   :  { %17 = vsyncpa [#allocation4], 0 }
   0x4   :  { %18 = vsyncpa [#allocation13], 0  ;;  %s366_s27 = smov [#allocation5]   ;;  %s367_s29 = smov [#allocation8]  }
   0x5   :  { %s36_s28 = sshll.u32 %s366_s27, 4  ;;  %s60_s30 = sshll.u32 %s367_s29, 4  ;;  %s37_s28 = int_to_ptr.vmem [resolvable:$true] %s36_s28  ;;  %s421_s30 = int_to_ptr.vmem [resolvable:$true] %s60_s30 }
   0x6   :  { %s180_s11 = scalar_lea.hbm %s573_s1, 256 }
   0x7   :  { %p181_p0 = scmp.ne.s32.totalorder %s573_s1, %s180_s11  ;;  %p184_p1 = scmp.lt.u32.totalorder %s180_s11, %s573_s1 }
   0x9   :  { %p186_p2 = pnand %p184_p1, %p181_p0 }
   0xb   :  { %189 = shalt.err (!%p186_p2)
}
   0xc   :  { %s190_s16 = scalar_lea.vmem %s37_s28, 256  ;;  %p195_p4 = scmp.lt.s32.totalorder %s37_s28, %s37_s28 }
   0xd   :  { %p191_p3 = scmp.ne.s32.totalorder %s37_s28, %s190_s16  ;;  %p196_p5 = scmp.lt.s32.totalorder %s190_s16, %s190_s16 }
   0xf   :  { %p197_p6 = por %p196_p5, %p195_p4 }
  0x11   :  { %p198_p7 = pnand %p197_p6, %p191_p3 }
  0x13   :  { %201 = shalt.err (!%p198_p7)
}
  0x14   :  { %s368_s17 = smov 128   ;;  %s369_s18 = smov 8  }
  0x15   :  { %42 = dma.hbm_to_vmem [thread:$0]  %s573_s1, 256, %s37_s28, [#allocation6], %s368_s17, %s368_s17, %s369_s18  }
  0x16   :  { %s202_s23 = scalar_lea.hbm %s575_s3, 256 }
  0x17   :  { %p203_p8 = scmp.ne.s32.totalorder %s575_s3, %s202_s23  ;;  %p206_p9 = scmp.lt.u32.totalorder %s202_s23, %s575_s3 }
  0x19   :  { %p208_p10 = pnand %p206_p9, %p203_p8 }
  0x1b   :  { %211 = shalt.err (!%p208_p10)
}
  0x1c   :  { %s212_s29 = scalar_lea.vmem %s421_s30, 256  ;;  %p217_p12 = scmp.lt.s32.totalorder %s421_s30, %s421_s30 }
  0x1d   :  { %p213_p11 = scmp.ne.s32.totalorder %s421_s30, %s212_s29  ;;  %p218_p13 = scmp.lt.s32.totalorder %s212_s29, %s212_s29 }
  0x1f   :  { %p219_p0 = por %p218_p13, %p217_p12 }
  0x21   :  { %p220_p1 = pnand %p219_p0, %p213_p11 }
  0x23   :  { %223 = shalt.err (!%p220_p1)
}
  0x24   :  { %66 = dma.hbm_to_vmem [thread:$0]  %s575_s3, 256, %s421_s30, [#allocation9], %s368_s17, %s368_s17, %s369_s18  }
  0x25   :  { %s370_s9 = smov [#allocation2]   ;;  %s371_s11 = smov [#allocation7]  }
  0x26   :  { %s24_s10 = sshll.u32 %s370_s9, 4  ;;  %s48_s12 = sshll.u32 %s371_s11, 4  ;;  %s25_s10 = int_to_ptr.vmem [resolvable:$true] %s24_s10  ;;  %s458_s12 = int_to_ptr.vmem [resolvable:$true] %s48_s12 }
  0x27   :  { %s224_s15 = scalar_lea.hbm %s572_s0, 256 }
  0x28   :  { %p225_p2 = scmp.ne.s32.totalorder %s572_s0, %s224_s15  ;;  %p228_p3 = scmp.lt.u32.totalorder %s224_s15, %s572_s0 }
  0x2a   :  { %p230_p4 = pnand %p228_p3, %p225_p2 }
  0x2c   :  { %233 = shalt.err (!%p230_p4)
}
  0x2d   :  { %s234_s3 = scalar_lea.vmem %s25_s10, 256  ;;  %p239_p6 = scmp.lt.s32.totalorder %s25_s10, %s25_s10 }
  0x2e   :  { %p235_p5 = scmp.ne.s32.totalorder %s25_s10, %s234_s3  ;;  %p240_p7 = scmp.lt.s32.totalorder %s234_s3, %s234_s3 }
  0x30   :  { %p241_p8 = por %p240_p7, %p239_p6 }
  0x32   :  { %p242_p9 = pnand %p241_p8, %p235_p5 }
  0x34   :  { %245 = shalt.err (!%p242_p9)
}
  0x35   :  { %30 = dma.hbm_to_vmem [thread:$0]  %s572_s0, 256, %s25_s10, [#allocation3], %s368_s17, %s368_s17, %s369_s18  }
  0x36   :  { %s246_s25 = scalar_lea.hbm %s574_s2, 256 }
  0x37   :  { %p247_p10 = scmp.ne.s32.totalorder %s574_s2, %s246_s25  ;;  %p250_p11 = scmp.lt.u32.totalorder %s246_s25, %s574_s2 }
  0x39   :  { %p252_p12 = pnand %p250_p11, %p247_p10 }
  0x3b   :  { %255 = shalt.err (!%p252_p12)
}
  0x3c   :  { %s256_s28 = scalar_lea.vmem %s458_s12, 256  ;;  %p261_p0 = scmp.lt.s32.totalorder %s458_s12, %s458_s12 }
  0x3d   :  { %p257_p13 = scmp.ne.s32.totalorder %s458_s12, %s256_s28  ;;  %p262_p1 = scmp.lt.s32.totalorder %s256_s28, %s256_s28 }
  0x3f   :  { %p263_p2 = por %p262_p1, %p261_p0 }
  0x41   :  { %p264_p3 = pnand %p263_p2, %p257_p13 }
  0x43   :  { %267 = shalt.err (!%p264_p3)
}
  0x44   :  { %54 = dma.hbm_to_vmem [thread:$0]  %s574_s2, 256, %s458_s12, [#allocation6], %s368_s17, %s368_s17, %s369_s18  }
  0x45   :  { %s372_s10 = smov [#allocation10]   ;;  %s268_s15 = scalar_lea.hbm %s576_s4, 256 }
  0x46   :  { %s72_s11 = sshll.u32 %s372_s10, 4  ;;  %p269_p4 = scmp.ne.s32.totalorder %s576_s4, %s268_s15  ;;  %s73_s11 = int_to_ptr.vmem [resolvable:$true] %s72_s11 }
  0x47   :  { %p272_p5 = scmp.lt.u32.totalorder %s268_s15, %s576_s4 }
  0x49   :  { %p274_p6 = pnand %p272_p5, %p269_p4 }
  0x4b   :  { %277 = shalt.err (!%p274_p6)
}
  0x4c   :  { %s278_s3 = scalar_lea.vmem %s73_s11, 256  ;;  %p283_p8 = scmp.lt.s32.totalorder %s73_s11, %s73_s11 }
  0x4d   :  { %p279_p7 = scmp.ne.s32.totalorder %s73_s11, %s278_s3  ;;  %p284_p9 = scmp.lt.s32.totalorder %s278_s3, %s278_s3 }
  0x4f   :  { %p285_p10 = por %p284_p9, %p283_p8 }
  0x51   :  { %p286_p11 = pnand %p285_p10, %p279_p7 }
  0x53   :  { %289 = shalt.err (!%p286_p11)
}
  0x54   :  { %78 = dma.hbm_to_vmem [thread:$0]  %s576_s4, 256, %s73_s11, [#allocation9], %s368_s17, %s368_s17, %s369_s18  }
  0x55   :  { %356 = dma.done.wait [#allocation3], 256  }
  0x56   :  { %357 = vsyncadd [#allocation3], 4294967040 }
  0x57   :  { %358 = dma.done.wait [#allocation6], 512  }
  0x58   :  { %359 = vsyncadd [#allocation6], 4294966784 }
  0x59   :  { %360 = dma.done.wait [#allocation9], 512  }
  0x5a   :  { %361 = vsyncadd [#allocation9], 4294966784  ;;  %v104_v0 = vld [vmem:[#allocation7] sm:$0xff]  ;;  %v105_v1 = vld [vmem:[#allocation7 + $0x8] sm:$0xff]  ;;  %vm110_vm0 = vcmask 785408   ;;  %s373_s30 = smov [#allocation12]  }
  0x5b   :  { %v106_v2 = vld [vmem:[#allocation8] sm:$0xff]  ;;  %v107_v3 = vld [vmem:[#allocation8 + $0x8] sm:$0xff]  ;;  %v96_v5 = vld [vmem:[#allocation2] sm:$0xff]  ;;  %s142_s4 = sshll.u32 %s373_s30, 4  ;;  %vm121_vm1 = vcmask 523264   ;;  %s374_s24 = smov [#allocation11]   ;;  %s143_s4 = int_to_ptr.vmem [resolvable:$true] %s142_s4 }
  0x5c   :  { %v108_v4 = vmul.f32 %v106_v2, %v104_v0  ;;  %v97_v6 = vld [vmem:[#allocation2 + $0x8] sm:$0xff]  ;;  %v109_v7 = vmul.f32 %v107_v3, %v105_v1  ;;  %v98_v8 = vld [vmem:[#allocation5] sm:$0xff]  ;;  %v99_v9 = vld [vmem:[#allocation5 + $0x8] sm:$0xff]  ;;  %s132_s25 = sshll.u32 %s374_s24, 4  ;;  %s375_s26 = smov [#allocation14]   ;;  %s520_s25 = int_to_ptr.vmem [resolvable:$true] %s132_s25 }
  0x5d   :  { %v115_v10 = vld [vmem:[#allocation10] sm:$0xff]  ;;  %v100_v12 = vmul.f32 %v98_v8, %v96_v5  ;;  %v101_v13 = vmul.f32 %v99_v9, %v97_v6  ;;  %v116_v14 = vld [vmem:[#allocation10 + $0x8] sm:$0xff]  ;;  %s152_s27 = sshll.u32 %s375_s26, 4  ;;  %p295_p13 = scmp.lt.s32.totalorder %s143_s4, %s143_s4  ;;  %s523_s27 = int_to_ptr.vmem [resolvable:$true] %s152_s27 }
  0x5e   :  { %v111_v11 = vsel %vm110_vm0, %v108_v4, 0.0  ;;  %v117_v15 = vld [vmem:[%s577_s5] sm:$0xff]  ;;  %v118_v16 = vld [vmem:[%s577_s5 + $0x8] sm:$0xff]  ;;  %v112_v17 = vsel %vm110_vm0, %v109_v7, 0.0  ;;  %s290_s5 = scalar_lea.vmem %s143_s4, 128 }
  0x5f   :  { %v119_v18 = vmul.f32 %v117_v15, %v115_v10  ;;  %v120_v19 = vmul.f32 %v118_v16, %v116_v14  ;;  %v113_v20 = vadd.f32 %v112_v17, %v111_v11  ;;  %v102_v21 = vadd.f32 %v101_v13, %v100_v12  ;;  %p291_p12 = scmp.ne.s32.totalorder %s143_s4, %s290_s5  ;;  %p296_p0 = scmp.lt.s32.totalorder %s290_s5, %s290_s5 }
  0x61   :  { %v122_v22 = vsel %vm121_vm1, %v119_v18, 0.0  ;;  %v123_v23 = vsel %vm121_vm1, %v120_v19, 0.0  ;;  %114 = vst.msk [vmem:[#allocation12] sm:$0xff] %vm110_vm0, %v113_v20  ;;  %103 = vst [vmem:[#allocation11] sm:$0xff] %v102_v21  ;;  %p297_p1 = por %p296_p0, %p295_p13 }
  0x62   :  { %v124_v24 = vadd.f32 %v123_v23, %v122_v22 }
  0x63   :  { %p298_p2 = pnand %p297_p1, %p291_p12 }
  0x65   :  { %301 = shalt.err (!%p298_p2)
}
  0x66   :  { %s302_s28 = scalar_lea.hbm %s579_s7, 128 }
  0x67   :  { %p303_p3 = scmp.ne.s32.totalorder %s579_s7, %s302_s28  ;;  %p306_p4 = scmp.lt.u32.totalorder %s302_s28, %s579_s7 }
  0x69   :  { %p308_p5 = pnand %p306_p4, %p303_p3 }
  0x6b   :  { %311 = shalt.err (!%p308_p5)
}
  0x6c   :  { %145 = dma.vmem_to_hbm [thread:$0]  %s143_s4, 128, %s579_s7, [#allocation13]   ;;  %125 = vst.msk [vmem:[#allocation14] sm:$0xff] %vm121_vm1, %v124_v24 }
  0x6d   :  { %s312_s15 = scalar_lea.vmem %s520_s25, 128  ;;  %p317_p7 = scmp.lt.s32.totalorder %s520_s25, %s520_s25 }
  0x6e   :  { %p313_p6 = scmp.ne.s32.totalorder %s520_s25, %s312_s15  ;;  %p318_p8 = scmp.lt.s32.totalorder %s312_s15, %s312_s15 }
  0x70   :  { %p319_p9 = por %p318_p8, %p317_p7 }
  0x72   :  { %p320_p10 = pnand %p319_p9, %p313_p6 }
  0x74   :  { %323 = shalt.err (!%p320_p10)
}
  0x75   :  { %s324_s20 = scalar_lea.hbm %s578_s6, 128 }
  0x76   :  { %p325_p11 = scmp.ne.s32.totalorder %s578_s6, %s324_s20  ;;  %p328_p12 = scmp.lt.u32.totalorder %s324_s20, %s578_s6 }
  0x78   :  { %p330_p13 = pnand %p328_p12, %p325_p11 }
  0x7a   :  { %333 = shalt.err (!%p330_p13)
}
  0x7b   :  { %135 = dma.vmem_to_hbm [thread:$0]  %s520_s25, 128, %s578_s6, [#allocation4]  }
  0x7c   :  { %s334_s4 = scalar_lea.vmem %s523_s27, 128  ;;  %p339_p1 = scmp.lt.s32.totalorder %s523_s27, %s523_s27 }
  0x7d   :  { %p335_p0 = scmp.ne.s32.totalorder %s523_s27, %s334_s4  ;;  %p340_p2 = scmp.lt.s32.totalorder %s334_s4, %s334_s4 }
  0x7f   :  { %p341_p3 = por %p340_p2, %p339_p1 }
  0x81   :  { %p342_p4 = pnand %p341_p3, %p335_p0 }
  0x83   :  { %345 = shalt.err (!%p342_p4)
}
  0x84   :  { %s346_s22 = scalar_lea.hbm %s580_s8, 128 }
  0x85   :  { %p347_p5 = scmp.ne.s32.totalorder %s580_s8, %s346_s22  ;;  %p350_p6 = scmp.lt.u32.totalorder %s346_s22, %s580_s8 }
  0x87   :  { %p352_p7 = pnand %p350_p6, %p347_p5 }
  0x89   :  { %355 = shalt.err (!%p352_p7)
}
  0x8a   :  { %155 = dma.vmem_to_hbm [thread:$0]  %s523_s27, 128, %s580_s8, [#allocation13]  }
  0x8b   :  { %362 = dma.done.wait [#allocation4], 128  }
  0x8c   :  { %363 = vsyncadd [#allocation4], 4294967168 }
  0x8d   :  { %364 = dma.done.wait [#allocation13], 256  }
  0x8e   :  { %365 = vsyncadd [#allocation13], 4294967040 }
  0x8f   :  { %165 = vsyncpa [#allocation3], 1 }
  0x90   :  { %166 = vsyncpa [#allocation6], 1 }
  0x91   :  { %167 = vsyncpa [#allocation9], 1 }
  0x92   :  { %168 = vsyncpa [#allocation4], 1 }
  0x93   :  { %169 = vsyncpa [#allocation13], 1 }

</bundles_post_ra>
